<compile_context>
chip_gen: v5e
topology: v5e:2x2
jax: 0.10.0
libtpu: 0.0.40
codegen_flags: <defaults>
</compile_context>

<pallas_src>
import functools
import math

import jax
import jax.numpy as jnp
from jax import lax
from jax.experimental import pallas as pl
from jax.experimental.pallas import tpu as pltpu


def _pick_tile(n, target, mult):
    """Largest multiple-of-`mult` tile <= target that divides n, else n itself.

    TODO(synk): support ragged n via pl.cdiv grids + masked tail tiles instead
    of falling back to one full-size block.
    """
    if n <= target:
        return n
    t = (target // mult) * mult
    while t >= mult:
        if n % t == 0:
            return t
        t -= mult
    return n


# ---------------------------------------------------------------------------
# Kernel 1: fused QKV projection, head-major outputs (K pre-transposed).
# ---------------------------------------------------------------------------
def _qkv_head_kernel(x_ref, w_ref, b_ref, q_ref, k_ref, v_ref):
    # x_ref : (tm, C)     activation tile          (compute dtype)
    # w_ref : (C, 3*hd)   this head's [Wq|Wk|Wv]   (compute dtype, Q pre-scaled)
    # b_ref : (1, 3*hd)   this head's bias         (f32, Q pre-scaled)
    # q_ref : (tm, hd)    k_ref : (hd, tm)    v_ref : (tm, hd)
    hd = q_ref.shape[-1]
    acc = jnp.dot(x_ref[...], w_ref[...], preferred_element_type=jnp.float32)
    acc = acc + b_ref[...]
    q_ref[...] = acc[:, :hd].astype(q_ref.dtype)
    # K stored pre-transposed (hd, T): kernel 2's QK^T becomes a plain NN
    # matmul and the K tile is lane-dense along T.
    k_ref[...] = acc[:, hd:2 * hd].T.astype(k_ref.dtype)
    v_ref[...] = acc[:, 2 * hd:].astype(v_ref.dtype)


# ---------------------------------------------------------------------------
# Kernel 2: flash-style causal attention fused with the output projection.
# ---------------------------------------------------------------------------
def _flash_attn_proj_kernel(q_ref, k_ref, v_ref, wp_ref, bp_ref, o_ref,
                            acc_ref, *, kv_tile):
    # q_ref : (tq, hd)   queries for this (batch, head, q-tile), pre-scaled
    # k_ref : (H, hd, T) keys for this batch row   (resident across q-tiles/heads)
    # v_ref : (H, T, hd) values for this batch row (resident across q-tiles/heads)
    # wp_ref: (C, C)     c_proj weight (in, out)   (resident, fetched once)
    # bp_ref: (1, C)     c_proj bias
    # o_ref : (tq, C)    output tile (written on the last head only)
    # acc_ref: (tq, C)   f32 scratch accumulating the head-merged projection
    qi = pl.program_id(1)
    h = pl.program_id(2)
    n_head = pl.num_programs(2)

    tq, hd = q_ref.shape
    tk = kv_tile

    @pl.when(h == 0)
    def _():
        acc_ref[...] = jnp.zeros_like(acc_ref)

    q = q_ref[...]
    q_start = qi * tq
    # Causal tile skipping: only KV tiles intersecting [0, q_start + tq).
    n_kv = (q_start + tq + tk - 1) // tk

    def kv_step(kv, carry):
        m_prev, l_prev, y_prev = carry
        start = pl.multiple_of(kv * tk, tk)
        k_t = k_ref[h, :, pl.ds(start, tk)]        # (hd, tk), lane-dense
        v_t = v_ref[h, pl.ds(start, tk), :]        # (tk, hd)
        s = jnp.dot(q, k_t, preferred_element_type=jnp.float32)   # (tq, tk)

        def masked(s_):
            row = lax.broadcasted_iota(jnp.int32, (tq, tk), 0) + q_start
            col = lax.broadcasted_iota(jnp.int32, (tq, tk), 1) + start
            return jnp.where(col <= row, s_, -1e30)

        # Only tiles straddling the diagonal pay for the mask; tiles fully
        # below the diagonal skip the iota/compare/select entirely.
        s = lax.cond(start + tk - 1 > q_start, masked, lambda s_: s_, s)

        # Online softmax update (f32 statistics).
        m_cur = jnp.max(s, axis=-1, keepdims=True)
        m_new = jnp.maximum(m_prev, m_cur)
        alpha = jnp.exp(m_prev - m_new)
        p = jnp.exp(s - m_new)
        l_new = alpha * l_prev + jnp.sum(p, axis=-1, keepdims=True)
        y_new = alpha * y_prev + jnp.dot(p.astype(v_t.dtype), v_t,
                                         preferred_element_type=jnp.float32)
        return m_new, l_new, y_new

    m0 = jnp.full((tq, 1), -jnp.inf, jnp.float32)
    l0 = jnp.zeros((tq, 1), jnp.float32)
    y0 = jnp.zeros((tq, hd), jnp.float32)
    _, l, y = lax.fori_loop(0, n_kv, kv_step, (m0, l0, y0))

    # Softmax normalization on the EUP (approx reciprocal, ~2^-12 rel err).
    y = y * pl.reciprocal(l, approx=True)                      # (tq, hd) f32

    # Fused head merge + c_proj: accumulate y_h @ Wproj[h*hd:(h+1)*hd, :].
    wp_h = wp_ref[pl.ds(pl.multiple_of(h * hd, hd), hd), :]    # (hd, C)
    acc_ref[...] += jnp.dot(y.astype(wp_ref.dtype), wp_h,
                            preferred_element_type=jnp.float32)

    @pl.when(h == n_head - 1)
    def _():
        o_ref[...] = (acc_ref[...] + bp_ref[...]).astype(o_ref.dtype)


# ---------------------------------------------------------------------------
# Wrapper: full CausalSelfAttention forward pass.
# ---------------------------------------------------------------------------
def causal_self_attention(x, w_attn, b_attn, w_proj, b_proj, n_head, *,
                          compute_dtype=jnp.bfloat16,
                          q_tile=128, kv_tile=512, row_tile=512):
    """x: (B,T,C); weights in PyTorch nn.Linear layout (out_features, in_features)."""
    B, T, C = x.shape
    assert C % n_head == 0
    H = n_head
    hd = C // H
    f32 = jnp.float32

    # ---- one-time layout plumbing (wrapper / XLA) -------------------------
    scale = 1.0 / math.sqrt(hd)
    qkv_scale = jnp.concatenate(
        [jnp.full((C,), scale, f32), jnp.ones((2 * C,), f32)])
    w_t = w_attn.astype(f32).T * qkv_scale[None, :]             # (C, 3C)
    b_s = b_attn.astype(f32) * qkv_scale                        # (3C,)
    # Per-head [Wq|Wk|Wv] column blocks (N-tiling of the QKV weight).
    w_heads = (w_t.reshape(C, 3, H, hd).transpose(2, 0, 1, 3)
               .reshape(H, C, 3 * hd).astype(compute_dtype))    # (H, C, 3hd)
    b_heads = (b_s.reshape(3, H, hd).transpose(1, 0, 2)
               .reshape(H, 1, 3 * hd))                          # (H, 1, 3hd) f32
    w_proj_t = w_proj.astype(f32).T.astype(compute_dtype)       # (C, C) (in, out)
    b_proj_2 = b_proj.astype(f32).reshape(1, C)

    # ---- tile sizes --------------------------------------------------------
    tm = _pick_tile(T, row_tile, 128)   # kernel-1 row tile (also K lane dim)
    tq = _pick_tile(T, q_tile, 16)      # kernel-2 query tile
    tk = _pick_tile(T, kv_tile, 128)    # kernel-2 KV tile (lane-aligned starts)

    # ---- kernel 1: fused QKV projection, head-major outputs ---------------
    # grid = (H, B, T//tm): per-head weight slice is outermost -> DMA'd once
    # per head; the (tm, C) activation tile is re-read H times (cheaper than
    # streaming the weight B*T/tm times for typical C).
    x_c = x.astype(compute_dtype)
    q, k, v = pl.pallas_call(
        _qkv_head_kernel,
        out_shape=(
            jax.ShapeDtypeStruct((B, H, T, hd), compute_dtype),
            jax.ShapeDtypeStruct((B, H, hd, T), compute_dtype),   # K pre-transposed
            jax.ShapeDtypeStruct((B, H, T, hd), compute_dtype),
        ),
        grid_spec=pltpu.PrefetchScalarGridSpec(
            num_scalar_prefetch=0,
            grid=(H, B, T // tm),
            in_specs=[
                pl.BlockSpec((None, tm, C), lambda h, b, i: (b, i, 0)),
                pl.BlockSpec((None, C, 3 * hd), lambda h, b, i: (h, 0, 0)),
                pl.BlockSpec((None, 1, 3 * hd), lambda h, b, i: (h, 0, 0)),
            ],
            out_specs=(
                pl.BlockSpec((None, None, tm, hd), lambda h, b, i: (b, h, i, 0)),
                pl.BlockSpec((None, None, hd, tm), lambda h, b, i: (b, h, 0, i)),
                pl.BlockSpec((None, None, tm, hd), lambda h, b, i: (b, h, i, 0)),
            ),
        ),
        compiler_params=pltpu.CompilerParams(
            dimension_semantics=("parallel", "parallel", "parallel")),
    )(x_c, w_heads, b_heads)

    # ---- kernel 2: flash causal attention + fused output projection -------
    # grid = (B, T//tq, H): K/V block index depends only on b -> fetched once
    # per batch row, resident across all q-tiles and heads; w_proj index map is
    # constant -> fetched once; head axis is the c_proj reduction axis.
    itemsize = jnp.dtype(compute_dtype).itemsize
    vmem_est = (2 * 2 * T * C * itemsize          # K + V blocks (double-buffered)
                + 2 * C * C * itemsize            # resident c_proj weight
                + 2 * tq * hd * itemsize          # q tile
                + 2 * tq * C * x.dtype.itemsize   # output tile
                + tq * C * 4 + 2 * C * 4)         # f32 accumulator + bias
    vmem_limit = int(vmem_est * 1.25) if vmem_est > (32 << 20) else None
    # TODO(synk): for very long T (per-batch K/V no longer fits VMEM, notably
    # on v7x's 64 MiB), switch K/V to per-(b,h) streaming with manual
    # double-buffered DMA over KV tiles.

    out = pl.pallas_call(
        functools.partial(_flash_attn_proj_kernel, kv_tile=tk),
        out_shape=jax.ShapeDtypeStruct((B, T, C), x.dtype),
        grid_spec=pltpu.PrefetchScalarGridSpec(
            num_scalar_prefetch=0,
            grid=(B, T // tq, H),
            in_specs=[
                pl.BlockSpec((None, None, tq, hd), lambda b, qi, h: (b, h, qi, 0)),
                pl.BlockSpec((None, H, hd, T), lambda b, qi, h: (b, 0, 0, 0)),
                pl.BlockSpec((None, H, T, hd), lambda b, qi, h: (b, 0, 0, 0)),
                pl.BlockSpec((C, C), lambda b, qi, h: (0, 0)),
                pl.BlockSpec((1, C), lambda b, qi, h: (0, 0)),
            ],
            out_specs=pl.BlockSpec((None, tq, C), lambda b, qi, h: (b, qi, 0)),
            scratch_shapes=[pltpu.VMEM((tq, C), jnp.float32)],
        ),
        compiler_params=pltpu.CompilerParams(
            dimension_semantics=("parallel", "parallel", "arbitrary"),
            vmem_limit_bytes=vmem_limit),
    )(q, k, v, w_proj_t, b_proj_2)
    return out


# ---------------------------------------------------------------------------
# Pure-JAX reference mirroring the PyTorch forward (f32).
# ---------------------------------------------------------------------------
def _reference(x, w_attn, b_attn, w_proj, b_proj, n_head):
    B, T, C = x.shape
    hd = C // n_head
    qkv = jnp.einsum('btc,oc->bto', x, w_attn) + b_attn
    q, k, v = jnp.split(qkv, 3, axis=2)
    def heads(z):  # (B,T,C) -> (B,H,T,hd)
        return z.reshape(B, T, n_head, hd).transpose(0, 2, 1, 3)
    q, k, v = heads(q), heads(k), heads(v)
    att = jnp.einsum('bhqd,bhkd->bhqk', q, k) / math.sqrt(hd)
    mask = jnp.tril(jnp.ones((T, T), bool))
    att = jnp.where(mask[None, None], att, -jnp.inf)
    att = jax.nn.softmax(att, axis=-1)
    y = jnp.einsum('bhqk,bhkd->bhqd', att, v)
    y = y.transpose(0, 2, 1, 3).reshape(B, T, C)
    return jnp.einsum('btc,oc->bto', y, w_proj) + b_proj


if __name__ == "__main__":
    # config: n_embd=32, n_head=4, n_seq=8 ; batch=2
    B, T, C, n_head = 2, 8, 32, 4

    key = jax.random.PRNGKey(0)
    kx, k1, k2, k3, k4 = jax.random.split(key, 5)

    x = jax.random.normal(kx, (B, T, C), jnp.float32)

    # PyTorch-Linear-style init: U(-1/sqrt(fan_in), 1/sqrt(fan_in))
    bound = 1.0 / math.sqrt(C)
    w_attn = jax.random.uniform(k1, (3 * C, C), jnp.float32, -bound, bound)
    b_attn = jax.random.uniform(k2, (3 * C,), jnp.float32, -bound, bound)
    w_proj = jax.random.uniform(k3, (C, C), jnp.float32, -bound, bound)
    b_proj = jax.random.uniform(k4, (C,), jnp.float32, -bound, bound)

    ref = _reference(x, w_attn, b_attn, w_proj, b_proj, n_head)

    # bf16 MXU operands -> relaxed tolerance vs the f32 reference.
    out = causal_self_attention(x, w_attn, b_attn, w_proj, b_proj, n_head)
    out = jax.block_until_ready(out)
    assert out.shape == (B, T, C)
    assert jnp.allclose(out, ref, atol=3e-2, rtol=3e-2), "bf16 mismatch vs reference"

    # f32 path (tolerance covers the approximate EUP reciprocal / MXU rounding).
    out_f32 = causal_self_attention(x, w_attn, b_attn, w_proj, b_proj, n_head,
                                    compute_dtype=jnp.float32)
    out_f32 = jax.block_until_ready(out_f32)
    assert jnp.allclose(out_f32, ref, atol=1e-2, rtol=1e-2), "f32 mismatch vs reference"

    print("KERNEL_OK")
</pallas_src>

<mosaic_0001>
module attributes {stable_mosaic.version = 11 : i64} {
  func.func @_qkv_head_kernel(%arg0: i32, %arg1: i32, %arg2: i32, %arg3: memref<1x8x32xbf16, #tpu.memory_space<vmem>>, %arg4: memref<1x32x24xbf16, #tpu.memory_space<vmem>>, %arg5: memref<1x1x24xf32, #tpu.memory_space<vmem>>, %arg6: memref<1x1x8x8xbf16, #tpu.memory_space<vmem>>, %arg7: memref<1x1x8x8xbf16, #tpu.memory_space<vmem>>, %arg8: memref<1x1x8x8xbf16, #tpu.memory_space<vmem>>) attributes {dimension_semantics = [#tpu.dimension_semantics<parallel>, #tpu.dimension_semantics<parallel>, #tpu.dimension_semantics<parallel>], iteration_bounds = array<i64: 4, 2, 1>, scalar_prefetch = 0 : i64, scratch_operands = 0 : i64, tpu.core_type = #tpu.core_type<tc>, window_params = [{transform_indices = @transform_0, window_bounds = array<i64: 1, 8, 32>}, {transform_indices = @transform_1, window_bounds = array<i64: 1, 32, 24>}, {transform_indices = @transform_2, window_bounds = array<i64: 1, 1, 24>}, {transform_indices = @transform_3, window_bounds = array<i64: 1, 1, 8, 8>}, {transform_indices = @transform_4, window_bounds = array<i64: 1, 1, 8, 8>}, {transform_indices = @transform_5, window_bounds = array<i64: 1, 1, 8, 8>}]} {
    %c0 = arith.constant 0 : index
    %c0_0 = arith.constant 0 : index
    %c0_1 = arith.constant 0 : index
    %0 = vector.load %arg3[%c0, %c0_0, %c0_1] : memref<1x8x32xbf16, #tpu.memory_space<vmem>>, vector<1x8x32xbf16>
    %1 = vector.shape_cast %0 : vector<1x8x32xbf16> to vector<8x32xbf16>
    %c0_2 = arith.constant 0 : index
    %c0_3 = arith.constant 0 : index
    %c0_4 = arith.constant 0 : index
    %2 = vector.load %arg4[%c0_2, %c0_3, %c0_4] : memref<1x32x24xbf16, #tpu.memory_space<vmem>>, vector<1x32x24xbf16>
    %3 = vector.shape_cast %2 : vector<1x32x24xbf16> to vector<32x24xbf16>
    %cst = arith.constant dense<0.000000e+00> : vector<8x24xf32>
    %4 = tpu.matmul %1, %3, %cst {dimension_numbers = #tpu.dot_dimension_numbers<[1], [0], [0], [1], [0, 0, 1, 1], [], []>} : vector<8x32xbf16>, vector<32x24xbf16>, vector<8x24xf32> -> vector<8x24xf32>
    %c0_5 = arith.constant 0 : index
    %c0_6 = arith.constant 0 : index
    %c0_7 = arith.constant 0 : index
    %5 = vector.load %arg5[%c0_5, %c0_6, %c0_7] : memref<1x1x24xf32, #tpu.memory_space<vmem>>, vector<1x1x24xf32>
    %6 = vector.shape_cast %5 : vector<1x1x24xf32> to vector<1x24xf32>
    %7 = vector.broadcast %6 : vector<1x24xf32> to vector<8x24xf32>
    %8 = arith.addf %4, %7 : vector<8x24xf32>
    %9 = vector.extract_strided_slice %8 {offsets = [0, 0], sizes = [8, 8], strides = [1, 1]} : vector<8x24xf32> to vector<8x8xf32>
    %10 = arith.truncf %9 : vector<8x8xf32> to vector<8x8xbf16>
    %c0_8 = arith.constant 0 : index
    %c0_9 = arith.constant 0 : index
    %c0_10 = arith.constant 0 : index
    %c0_11 = arith.constant 0 : index
    %11 = vector.load %arg6[%c0_8, %c0_9, %c0_10, %c0_11] : memref<1x1x8x8xbf16, #tpu.memory_space<vmem>>, vector<1x1x8x8xbf16>
    %12 = vector.shape_cast %11 : vector<1x1x8x8xbf16> to vector<8x8xbf16>
    %13 = vector.shape_cast %10 : vector<8x8xbf16> to vector<1x1x8x8xbf16>
    tpu.vector_store %arg6[%c0_8, %c0_9, %c0_10, %c0_11], %13 {strides = array<i32>} : memref<1x1x8x8xbf16, #tpu.memory_space<vmem>>, vector<1x1x8x8xbf16>,
    %14 = vector.extract_strided_slice %8 {offsets = [0, 8], sizes = [8, 8], strides = [1, 1]} : vector<8x24xf32> to vector<8x8xf32>
    %15 = tpu.transpose %14, [1, 0] : vector<8x8xf32> -> vector<8x8xf32>
    %16 = arith.truncf %15 : vector<8x8xf32> to vector<8x8xbf16>
    %c0_12 = arith.constant 0 : index
    %c0_13 = arith.constant 0 : index
    %c0_14 = arith.constant 0 : index
    %c0_15 = arith.constant 0 : index
    %17 = vector.load %arg7[%c0_12, %c0_13, %c0_14, %c0_15] : memref<1x1x8x8xbf16, #tpu.memory_space<vmem>>, vector<1x1x8x8xbf16>
    %18 = vector.shape_cast %17 : vector<1x1x8x8xbf16> to vector<8x8xbf16>
    %19 = vector.shape_cast %16 : vector<8x8xbf16> to vector<1x1x8x8xbf16>
    tpu.vector_store %arg7[%c0_12, %c0_13, %c0_14, %c0_15], %19 {strides = array<i32>} : memref<1x1x8x8xbf16, #tpu.memory_space<vmem>>, vector<1x1x8x8xbf16>,
    %20 = vector.extract_strided_slice %8 {offsets = [0, 16], sizes = [8, 8], strides = [1, 1]} : vector<8x24xf32> to vector<8x8xf32>
    %21 = arith.truncf %20 : vector<8x8xf32> to vector<8x8xbf16>
    %c0_16 = arith.constant 0 : index
    %c0_17 = arith.constant 0 : index
    %c0_18 = arith.constant 0 : index
    %c0_19 = arith.constant 0 : index
    %22 = vector.load %arg8[%c0_16, %c0_17, %c0_18, %c0_19] : memref<1x1x8x8xbf16, #tpu.memory_space<vmem>>, vector<1x1x8x8xbf16>
    %23 = vector.shape_cast %22 : vector<1x1x8x8xbf16> to vector<8x8xbf16>
    %24 = vector.shape_cast %21 : vector<8x8xbf16> to vector<1x1x8x8xbf16>
    tpu.vector_store %arg8[%c0_16, %c0_17, %c0_18, %c0_19], %24 {strides = array<i32>} : memref<1x1x8x8xbf16, #tpu.memory_space<vmem>>, vector<1x1x8x8xbf16>,
    return
  }
  func.func @transform_0(%arg0: i32, %arg1: i32, %arg2: i32) -> (i32, i32, i32) {
    %c0_i32 = arith.constant 0 : i32
    %c0_i32_0 = arith.constant 0 : i32
    return %arg1, %arg2, %c0_i32 : i32, i32, i32
  }
  func.func @transform_1(%arg0: i32, %arg1: i32, %arg2: i32) -> (i32, i32, i32) {
    %c0_i32 = arith.constant 0 : i32
    %c0_i32_0 = arith.constant 0 : i32
    %c0_i32_1 = arith.constant 0 : i32
    return %arg0, %c0_i32, %c0_i32_0 : i32, i32, i32
  }
  func.func @transform_2(%arg0: i32, %arg1: i32, %arg2: i32) -> (i32, i32, i32) {
    %c0_i32 = arith.constant 0 : i32
    %c0_i32_0 = arith.constant 0 : i32
    %c0_i32_1 = arith.constant 0 : i32
    return %arg0, %c0_i32, %c0_i32_0 : i32, i32, i32
  }
  func.func @transform_3(%arg0: i32, %arg1: i32, %arg2: i32) -> (i32, i32, i32, i32) {
    %c0_i32 = arith.constant 0 : i32
    %c0_i32_0 = arith.constant 0 : i32
    return %arg1, %arg0, %arg2, %c0_i32 : i32, i32, i32, i32
  }
  func.func @transform_4(%arg0: i32, %arg1: i32, %arg2: i32) -> (i32, i32, i32, i32) {
    %c0_i32 = arith.constant 0 : i32
    %c0_i32_0 = arith.constant 0 : i32
    return %arg1, %arg0, %c0_i32, %arg2 : i32, i32, i32, i32
  }
  func.func @transform_5(%arg0: i32, %arg1: i32, %arg2: i32) -> (i32, i32, i32, i32) {
    %c0_i32 = arith.constant 0 : i32
    %c0_i32_0 = arith.constant 0 : i32
    return %arg1, %arg0, %arg2, %c0_i32 : i32, i32, i32, i32
  }
}

</mosaic_0001>

<bundles_post_ra>
// kernel: tpu_custom_call.1
= control target key start
LH: loop header
LB: loop body
LE: loop exit
PB: predicated region body
PF: predicated region fallthrough
CT: control target
= control target key end

     0   :  { %s1127_s0 = inlined_call_operand.vmem [shape: bf16[2,8,32], index: 0, kind: input, shape index: {}]   ;;  %s1128_s1 = inlined_call_operand.vmem [shape: bf16[4,32,24], index: 1, kind: input, shape index: {}]   ;;  %s1129_s2 = inlined_call_operand.vmem [shape: f32[4,1,24], index: 2, kind: input, shape index: {}]   ;;  %s1130_s3 = inlined_call_operand.hbm [shape: bf16[2,4,8,8], index: 3, kind: output, shape index: {0}]   ;;  %s1131_s4 = inlined_call_operand.hbm [shape: bf16[2,4,8,8], index: 4, kind: output, shape index: {1}]   ;;  %s1132_s5 = inlined_call_operand.hbm [shape: bf16[2,4,8,8], index: 5, kind: output, shape index: {2}]  }
   0x1   :  { %1138 = sst [smem:[#allocation11_spill]] %s1127_s0 }
   0x2   :  { %1139 = sst [smem:[#allocation12_spill]] %s1128_s1 }
   0x3   :  { %11 = vsyncpa [#allocation3], 0 }
   0x4   :  { %13 = vsyncpa [#allocation3 + $0x1], 0 }
   0x5   :  { %14 = vsyncpa [#allocation5], 0 }
   0x6   :  { %16 = vsyncpa [#allocation5 + $0x1], 0  ;;  %s938_s18 = smov 0   ;;  %s940_s19 = smov 0  }
   0x7   :  { %s942_s20 = smov 0   ;;  %s944_s21 = smov 0  }
   0x8   :  { %s946_s22 = smov 0   ;;  %s948_s23 = smov 0  }
   0x9   :  { %s950_s24 = smov 0   ;;  %s952_s25 = smov 0  }
   0xa LB: > { %s1134_s26 = sadd.s32 4294967295, %s904_s25   ;;  %s1133_s27 = sadd.s32 4294967294, %s904_s25   ;;  %s904_s25 = sphi %s952_s25, %s22_s25   ;;  %s900_s24 = sphi %s950_s24, %s1157_s24   ;;  %s896_s23 = sphi %s948_s23, %s1156_s23   ;;  %s892_s22 = sphi %s946_s22, %s1155_s22   ;;  %s888_s21 = sphi %s944_s21, %s1154_s21   ;;  %s884_s20 = sphi %s942_s20, %s1153_s20   ;;  %s880_s19 = sphi %s940_s19, %s1152_s19   ;;  %s876_s18 = sphi %s938_s18, %s1151_s18  }
   0xb   : > { %s37_s28 = sadd.s32 1, %s896_s23  ;;  %s41_s29 = sadd.s32 1, %s900_s24 }
   0xc   : > { %p39_p0 = scmp.ge.s32.totalorder %s37_s28, 2  ;;  %p142_p1 = scmp.ne.s32.totalorder %s884_s20, %s880_s19 }
   0xd   : > { %p143_p2 = scmp.eq.s32.totalorder %s1134_s26, 7  ;;  %p148_p5 = scmp.ne.s32.totalorder %s880_s19, %s876_s18 }
   0xe   : > { %s1159_s28 = smov (%p39_p0, %s37_s28), 0  ;;  %s1161_s29 = smov (!%p39_p0, %s41_s29), %s900_s24 }
   0xf   : > { %1140 = sst [smem:[#allocation9_spill]] %s1159_s28  ;;  %s125_s30 = ssub.s32 %s896_s23, %s1159_s28 }
  0x10   : > { %p991_p3 = por %p143_p2, %p142_p1  ;;  %p43_p4 = scmp.ge.s32.totalorder %s1161_s29, 4 }
  0x11   : > { %p149_p6 = scmp.eq.s32.totalorder %s1133_s27, 7  ;;  %p635_p7 = scmp.ge.s32.totalorder %s904_s25, 1 }
  0x12   : > { %s1163_s29 = smov (%p43_p4, %s1161_s29), 0  ;;  %p251_p9 = scmp.lt.s32.totalorder %s904_s25, 9 }
  0x13   : > { %1142 = sst [smem:[#allocation10_spill]] %s1163_s29  ;;  %p1002_p8 = por %p149_p6, %p148_p5 }
  0x14   : > { %s126_s8 = ssub.s32 %s900_s24, %s1163_s29  ;;  %s132_s9 = sadd.s32 1, %s884_s20 }
  0x15   : > { %s127_s10 = sor.u32 %s126_s8, %s125_s30  ;;  %p252_p10 = pnand %p635_p7, %p251_p9 }
  0x16   : > { %p130_p11 = scmp.eq.s32.totalorder %s127_s10, 0  ;;  %p306_p12 = scmp.lt.s32.totalorder (!%p252_p10), %s892_s22, 3 }
  0x17   : > { %255 = sbr.rel (%p252_p10) target bundleno = 465 (0x1d1), region = 32  ;;  %p299_p13 = scmp.lt.s32.totalorder (!%p252_p10), %s888_s21, 1 }
  0x18   : > { %s1011_s11 = scalar_select %p130_p11, %s884_s20, %s132_s9  }
  0x19   : > { %s1144_s1 = sld [smem:[#allocation12_spill]] (!%p252_p10)  ;;  %s282_s28 = sand.u32 (!%p252_p10), 1, %s880_s19  }
  0x1a   : > { %s1145_s0 = sld [smem:[#allocation11_spill]] (!%p252_p10)  ;;  %s1027_s15 = sshll.u32 (!%p252_p10), %s282_s28, 2 }
  0x1b   : > { %s907_s26 = smov (!%p252_p10), 112   ;;  %s284_s27 = scalar_lea.vmem (!%p252_p10), [#allocation2], %s1027_s15 }
  0x1c   : > { %s307_s12 = scalar_select %p306_p12, %s892_s22, 3  ;;  %vm336_vm0 = vcmask 261120   ;;  %vm354_vm1 = vcmask 60416  }
  0x1d   : > { %s300_s13 = scalar_select %p299_p13, %s888_s21, 1 }
  0x1e   : > { %s662_s14 = sshll.u32 %s307_s12, 4  ;;  %s313_s17 = scalar_lea.vmem %s1129_s2, %s307_s12 }
  0x1f   : > { %s310_s9 = scalar_lea.vmem %s1144_s1, %s662_s14  ;;  %s639_s10 = sshll.u32 %s300_s13, 2  ;;  %v749_v3 = vld [vmem:[%s313_s17] ss:$0 sm:$0xff] }
  0x20   : > { %v664_v0 = vld [vmem:[%s310_s9 + $0x8] sm:$0xff]  ;;  %v663_v1 = vld [vmem:[%s310_s9] sm:$0xff]  ;;  %s305_s29 = scalar_lea.vmem %s1145_s0, %s639_s10  ;;  %s906_s12 = smov 120  }
  0x21   : > { %346 = vmatpush.bf16.msra.mxu0 %v664_v0  ;;  %v315_v2 = vld [vmem:[%s305_s29] sm:$0xf]  ;;  %s1137_s29 = scalar_lea.vmem [#allocation6], %s1027_s15  ;;  %s654_s13 = sshll.u32 %s888_s21, 2 }
  0x22   : > { %s421_s14 = sadd.s32 %s892_s22, %s654_s13  ;;  %s425_s9 = sshll.u32 %s284_s27, 4  ;;  %s426_s9 = int_to_ptr.vmem [resolvable:$true] %s425_s9 }
  0x23   : > { %s655_s16 = sshll.u32 %s421_s14, 2  ;;  %s770_s22 = scalar_lea.hbm %s1130_s3, 32 }
  0x24   : > { %s423_s8 = scalar_lea.hbm %s1130_s3, %s655_s16 }
  0x25   : > { %347 = vmatpush.bf16.msra.mxu0 %v663_v1  ;;  %s427_s10 = sshll.u32 %s423_s8, 4  ;;  %s428_s10 = int_to_ptr.hbm [resolvable:$true] %s427_s10 }
  0x28   : > { %650 = vmatmul.msk.bf16.vlgmr.msra.gmra.mxu0 %vm336_vm0, %v315_v2 }
  0xa5   : > { %v349_v4 = vpop.f32.mrf.mxu0 }
  0xa6   : > { %v350_v5 = vadd.f32 %v749_v3, %v349_v4 }
  0xa8   : > { %357 = vrot.lane.b32.xlu0 %v350_v5, %s906_s12  ;;  %v353_v6 = vpack.c.bf16 %v350_v5, %v350_v5  ;;  %s400_s12 = scalar_lea.sflag [#allocation3], %s282_s28 }
  0xaa   : > { %395 = vrot.lane.b32.xlu1 %v353_v6, %s907_s26  ;;  %355 = vst.msk [vmem:[%s284_s27] sm:$0xf] %vm354_vm1, %v353_v6  ;;  %s764_s26 = sshra.s32 %s428_s10, 4  ;;  %s765_s26 = int_to_ptr.hbm [resolvable:$true] %s764_s26 }
  0xab   : > { %s766_s0 = scalar_lea.hbm %s765_s26, 4  ;;  %p771_p4 = scmp.lt.s32.totalorder %s765_s26, %s1130_s3 }
  0xac   : > { %p767_p0 = scmp.ne.s32.totalorder %s765_s26, %s766_s0  ;;  %p772_p5 = scmp.lt.s32.totalorder %s770_s22, %s766_s0 }
  0xad   : > { %v351_v7 = vpop.f32.mrf.mxu0 }
  0xae   : > { %p768_p1 = pnand %p767_p0, %p991_p3  ;;  %p773_p6 = por %p772_p5, %p771_p4 }
  0xb0   : > { %p769_p2 = pneg %p768_p1 }
  0xb2   : > { %p774_p7 = pnand %p773_p6, %p769_p2 }
 0x11a   : > { %v358_v8 = vpop.permute.xlu0 %357 }
 0x11b   : > { %360 = vxpose.xlu0.b32.start.end [1/1] (short) (narrow) %v358_v8, 8 }
 0x11c   : > { %v396_v9 = vpop.permute.xlu1 %395 }
 0x11d   : > { %398 = vst.msk [vmem:[%s1137_s29] sm:$0xf] %vm354_vm1, %v396_v9 }
 0x11e   : > { %777 = shalt.err (!%p774_p7)
}
 0x11f   : > { %665 = dma.vmem_to_hbm [thread:$0]  (%p991_p3), %s426_s9, 64, %s428_s10, %s400_s12  }
 0x120   : > { %s440_s17 = scalar_lea.hbm %s1131_s4, %s655_s16  ;;  %s457_s8 = scalar_lea.hbm %s1132_s5, %s655_s16 }
 0x121   : > { %s1146_s21 = sadd.s32 4294967295, %s904_s25   ;;  %s291_s0 = scalar_lea.vmem [#allocation4], %s1027_s15 }
 0x122   : > { %s1058_s26 = sand.u32 1, %s1146_s21   ;;  %s442_s22 = sshll.u32 %s291_s0, 4  ;;  %s443_s22 = int_to_ptr.vmem [resolvable:$true] %s442_s22 }
 0x123   : > { %s444_s13 = sshll.u32 %s440_s17, 4  ;;  %s1147_s14 = scalar_lea.vmem [#allocation6], %s1027_s15  ;;  %s445_s13 = int_to_ptr.hbm [resolvable:$true] %s444_s13 }
 0x124   : > { %s1063_s1 = sshll.u32 %s1147_s14, 4  ;;  %s1065_s9 = sshll.u32 %s457_s8, 4  ;;  %s460_s1 = int_to_ptr.vmem [resolvable:$true] %s1063_s1  ;;  %s462_s9 = int_to_ptr.hbm [resolvable:$true] %s1065_s9 }
 0x125   : > { %s405_s16 = scalar_lea.sflag [#allocation5], %s1058_s26  ;;  %s792_s10 = sshra.s32 %s445_s13, 4  ;;  %s793_s10 = int_to_ptr.hbm [resolvable:$true] %s792_s10 }
 0x126   : > { %s794_s12 = scalar_lea.hbm %s793_s10, 4  ;;  %s798_s27 = scalar_lea.hbm %s1131_s4, 32 }
 0x127   : > { %p795_p9 = scmp.ne.s32.totalorder %s793_s10, %s794_s12  ;;  %p799_p12 = scmp.lt.s32.totalorder %s793_s10, %s1131_s4 }
 0x128   : > { %p800_p13 = scmp.lt.s32.totalorder %s798_s27, %s794_s12 }
 0x129   : > { %p796_p10 = pnand %p795_p9, %p991_p3 }
 0x12a   : > { %p801_p0 = por %p800_p13, %p799_p12 }
 0x12b   : > { %p797_p11 = pneg %p796_p10 }
 0x12d   : > { %p802_p1 = pnand %p801_p0, %p797_p11 }
 0x1bf   : > { %v376_v10 = vpop.trf.xlu0 }
 0x1c0   : > { %v392_v11 = vpack.c.bf16 %v376_v10, %v376_v10 }
 0x1c2   : > { %393 = vst.msk [vmem:[%s291_s0] sm:$0xf] %vm354_vm1, %v392_v11 }
 0x1c3   : > { %805 = shalt.err (!%p802_p1)
}
 0x1c4   : > { %666 = dma.vmem_to_hbm [thread:$0]  (%p991_p3), %s443_s22, 64, %s445_s13, %s405_s16  }
 0x1c5   : > { %s820_s30 = sshra.s32 %s462_s9, 4  ;;  %s826_s0 = scalar_lea.hbm %s1132_s5, 32  ;;  %s821_s30 = int_to_ptr.hbm [resolvable:$true] %s820_s30 }
 0x1c6   : > { %s822_s8 = scalar_lea.hbm %s821_s30, 4  ;;  %p827_p6 = scmp.lt.s32.totalorder %s821_s30, %s1132_s5 }
 0x1c7   : > { %p823_p2 = scmp.ne.s32.totalorder %s821_s30, %s822_s8  ;;  %p828_p7 = scmp.lt.s32.totalorder %s826_s0, %s822_s8 }
 0x1c9   : > { %p824_p4 = pnand %p823_p2, %p991_p3  ;;  %p829_p9 = por %p828_p7, %p827_p6 }
 0x1cb   : > { %p825_p5 = pneg %p824_p4 }
 0x1cd   : > { %p830_p10 = pnand %p829_p9, %p825_p5 }
 0x1cf   : > { %833 = shalt.err (!%p830_p10)
}
 0x1d0   : > { %667 = dma.vmem_to_hbm [thread:$0]  (%p991_p3), %s460_s1, 64, %s462_s9, %s405_s16  }
 0x1d1 PF: > { %p681_p11 = scmp.ge.s32.totalorder %s904_s25, 2  ;;  %s473_s22 = sand.u32 1, %s876_s18  }
 0x1d2   : > { %s474_s13 = scalar_lea.sflag [#allocation3], %s473_s22 }
 0x1d3   : > { %p672_p12 = pnand %p681_p11, %p1002_p8 }
 0x1d5   : > { %p673_p13 = pneg %p672_p12 }
 0x1d7   : > { %867 = dma.done.wait (%p673_p13), %s474_s13, 64  }
 0x1d8   : > { %869 = vsyncadd (%p673_p13), %s474_s13, 4294967232  ;;  %s1148_s12 = sadd.s32 4294967294, %s904_s25  }
 0x1d9   : > { %s483_s6 = sand.u32 1, %s1148_s12  }
 0x1da   : > { %s484_s15 = scalar_lea.sflag [#allocation5], %s483_s6 }
 0x1db   : > { %871 = dma.done.wait (%p673_p13), %s484_s15, 128  }
 0x1dc   : > { %873 = vsyncadd (%p673_p13), %s484_s15, 4294967168  ;;  %s22_s25 = sadd.s32 1, %s904_s25   ;;  %s1149_s1 = sld [smem:[#allocation9_spill]] }
 0x1dd   : > { %p19_p3 = scmp.ge.s32.totalorder %s22_s25, 10   ;;  %s1150_s7 = sld [smem:[#allocation10_spill]] }
 0x1de   : > { %s1151_s18 = smov %s880_s19  ;;  %s1152_s19 = smov %s884_s20 }
 0x1df   : > { %s1153_s20 = smov %s1011_s11  ;;  %s1154_s21 = smov %s896_s23 }
 0x1e0   : > { %s1155_s22 = smov %s900_s24  ;;  %21 = sbr.rel (!%p19_p3) target bundleno = 10 (0xa), region = 105 }
 0x1e2   : > { %s1156_s23 = smov %s1149_s1 }
 0x1e3   : > { %s1157_s24 = smov %s1150_s7 }
 0x1e5   :  { %500 = vsyncpa [#allocation3], 1 }
 0x1e6   :  { %502 = vsyncpa [#allocation3 + $0x1], 1 }
 0x1e7   :  { %503 = vsyncpa [#allocation5], 1 }
 0x1e8   :  { %505 = vsyncpa [#allocation5 + $0x1], 1 }

</bundles_post_ra>
